<compile_context>
chip_gen: v6e
topology: v6e:2x2x1
jax: 0.10.0
libtpu: 0.0.40
codegen_flags: <defaults>
</compile_context>

<pallas_src>
import math
import functools

import jax
import jax.numpy as jnp
from jax import lax
from jax.experimental import pallas as pl
from jax.experimental.pallas import tpu as pltpu


NEG_FILL = -1e9   # matches torch masked_fill(mask == 0, -1e9)


def _flash_attn_kernel(*refs, has_mask):
    """One (batch, head, q-tile) program; kv tiles stream along the innermost grid axis."""
    if has_mask:
        q_ref, k_ref, v_ref, mask_ref, o_ref, m_scr, l_scr, acc_scr = refs
    else:
        q_ref, k_ref, v_ref, o_ref, m_scr, l_scr, acc_scr = refs
        mask_ref = None

    ki = pl.program_id(3)

    @pl.when(ki == 0)
    def _():
        m_scr[...] = jnp.full(m_scr.shape, -jnp.inf, jnp.float32)
        l_scr[...] = jnp.zeros(l_scr.shape, jnp.float32)
        acc_scr[...] = jnp.zeros(acc_scr.shape, jnp.float32)

    q = q_ref[0, 0]                      # (TQ, d_k) bf16, already scaled by 1/sqrt(d_k)
    k = k_ref[0, 0]                      # (TK, d_k) bf16
    v = v_ref[0, 0]                      # (TK, d_k) bf16

    # q @ k^T by contracting on d_k directly (no explicit XLU transpose); f32 accumulation.
    s = lax.dot_general(q, k, (((1,), (1,)), ((), ())),
                        preferred_element_type=jnp.float32)            # (TQ, TK) f32
    if has_mask:
        # mask_ref[0] is (TQ, TK) or (1, TK); a single select per kv tile (no head loop,
        # no repeated broadcasts).  Exact masked_fill(-1e9) semantics, incl. fully-masked
        # rows (they yield a uniform attention distribution, same as torch).
        s = jnp.where(mask_ref[0] != 0, s, NEG_FILL)

    # Online (flash) softmax update -- mathematically exact vs. full softmax.
    m_prev = m_scr[...]                                                 # (TQ, 1)
    m_new = jnp.maximum(m_prev, jnp.max(s, axis=-1, keepdims=True))
    alpha = jnp.exp(m_prev - m_new)
    p = jnp.exp(s - m_new)
    l_scr[...] = alpha * l_scr[...] + jnp.sum(p, axis=-1, keepdims=True)
    acc_scr[...] = alpha * acc_scr[...] + jnp.dot(
        p.astype(jnp.bfloat16), v, preferred_element_type=jnp.float32)
    m_scr[...] = m_new

    @pl.when(ki == pl.num_programs(3) - 1)
    def _():
        inv_l = pl.reciprocal(l_scr[...], approx=True)                  # EUP slot
        o_ref[0, 0] = (acc_scr[...] * inv_l).astype(o_ref.dtype)


def _vmem_capacity_bytes():
    """Physical VMEM per core for the current generation (fallback: v7x's 64 MiB)."""
    try:
        cap = getattr(pltpu.get_tpu_info(), "vmem_capacity_bytes", None)
        if cap:
            return int(cap)
    except Exception:
        pass
    return 64 * 1024 * 1024


def _tile_vmem_bytes(tq, tk, d_k, mask_kind):
    """Rough per-step VMEM: double-buffered bf16 q/k/v/out blocks + int8 mask + f32 scratch."""
    b = 2 * tq * d_k * 2            # q
    b += 2 * 2 * tk * d_k * 2       # k, v
    b += 2 * tq * d_k * 2           # out
    if mask_kind == "full":
        b += 2 * tq * tk            # int8 (TQ, TK) mask tile
    elif mask_kind == "pad":
        b += 2 * tk                 # int8 (1, TK) key-padding tile
    b += tq * (d_k + 2) * 4         # f32 scratch: acc + m + l
    return b


def _choose_tk(S):
    """kv tile: multiple of 128 (lane-dense, legal for the int8 mask last dim) or full S."""
    if S % 128 == 0:
        for c in (512, 256, 128):
            if S % c == 0:
                return c
    return S


def _choose_tq(S, tk, d_k, mask_kind, vmem_budget):
    """Query tile: largest multiple of 32 dividing S that fits the VMEM budget, else full S."""
    if S % 32 != 0:
        return S                    # block == full dim is always legal
    cands = [c for c in (512, 256, 128, 64, 32) if S % c == 0]
    if not cands:
        return S
    for tq in cands:
        if _tile_vmem_bytes(tq, tk, d_k, mask_kind) <= vmem_budget // 2:
            return tq
    return cands[-1]


def multi_headed_attention(query, key, value, params, mask=None, *, h):
    """query/key/value: (B, S, d_model) f32.  mask: None, (B, S, S) or (B, 1, S)."""
    B, S, D = query.shape
    assert D % h == 0
    d_k = D // h
    out_dtype = query.dtype

    wq, bq, wk, bk, wv, bv, wo, bo = params

    # ---- Q/K/V projections as XLA GEMMs (already MXU-optimal; overlap with kernel DMA).
    #      bf16 operands, f32 accumulation.  Q pre-scaled by 1/sqrt(d_k) ONCE here.
    def proj(x, w, b):
        return jnp.dot(x.astype(jnp.bfloat16), w.T.astype(jnp.bfloat16),
                       preferred_element_type=jnp.float32) + b.astype(jnp.float32)

    scale = 1.0 / math.sqrt(d_k)
    q = (proj(query, wq, bq) * scale).astype(jnp.bfloat16)
    k = proj(key, wk, bk).astype(jnp.bfloat16)
    v = proj(value, wv, bv).astype(jnp.bfloat16)

    # Head-major (B, H, S, d_k): block last dim == d_k (always legal; lane-dense for
    # production d_k that is a multiple of 128).
    def to_heads(x):
        return x.reshape(B, S, h, d_k).transpose(0, 2, 1, 3)

    qh, kh, vh = to_heads(q), to_heads(k), to_heads(v)

    has_mask = mask is not None
    mask_kind = None
    mask_i8 = None
    if has_mask:
        assert mask.ndim == 3 and mask.shape[0] == B and mask.shape[2] == S
        assert mask.shape[1] in (1, S)
        mask_kind = "pad" if mask.shape[1] == 1 else "full"
        mask_i8 = (mask != 0).astype(jnp.int8)      # 4x less HBM/VMEM than f32

    # ---- Generation-aware VMEM budget and tile sizes.
    vmem_cap = _vmem_capacity_bytes()                           # 64 MiB v7x, 128 MiB v5e/v6e
    vmem_limit = min((vmem_cap * 3) // 4, 112 * 1024 * 1024)    # ~48 MiB v7x, ~96 MiB v5e/v6e
    TK = _choose_tk(S)
    TQ = _choose_tq(S, TK, d_k, mask_kind, vmem_limit)
    nq, nk = S // TQ, S // TK

    qo_spec = pl.BlockSpec((1, 1, TQ, d_k), lambda b, hd, qi, ki: (b, hd, qi, 0))
    kv_spec = pl.BlockSpec((1, 1, TK, d_k), lambda b, hd, qi, ki: (b, hd, ki, 0))

    in_specs = [qo_spec, kv_spec, kv_spec]
    args = [qh, kh, vh]
    if has_mask:
        if mask_kind == "pad":      # (B, 1, S) key-padding mask, never densified
            in_specs.append(pl.BlockSpec((1, 1, TK), lambda b, hd, qi, ki: (b, 0, ki)))
        else:                       # (B, S, S) mask, tiled over query rows and kv cols
            in_specs.append(pl.BlockSpec((1, TQ, TK), lambda b, hd, qi, ki: (b, qi, ki)))
        args.append(mask_i8)

    kernel = functools.partial(_flash_attn_kernel, has_mask=has_mask)

    ctx = pl.pallas_call(
        kernel,
        out_shape=jax.ShapeDtypeStruct((B, h, S, d_k), jnp.bfloat16),
        grid_spec=pltpu.PrefetchScalarGridSpec(
            num_scalar_prefetch=0,
            grid=(B, h, nq, nk),
            in_specs=in_specs,
            out_specs=qo_spec,
            scratch_shapes=[pltpu.VMEM((TQ, 1), jnp.float32),     # running max m
                            pltpu.VMEM((TQ, 1), jnp.float32),     # running sum l
                            pltpu.VMEM((TQ, d_k), jnp.float32)],  # f32 accumulator
        ),
        # No cross-step carry except along the innermost kv (reduction) axis, so batch,
        # head and query-tile axes are all megacore-parallel (works even for B=1).
        compiler_params=pltpu.CompilerParams(
            dimension_semantics=("parallel", "parallel", "parallel", "arbitrary"),
            vmem_limit_bytes=vmem_limit,
        ),
    )(*args)

    # Merge heads (B, H, S, d_k) -> (B, S, D) and apply the output projection (XLA GEMM).
    ctx = ctx.transpose(0, 2, 1, 3).reshape(B, S, D)
    out = jnp.dot(ctx, wo.T.astype(jnp.bfloat16),
                  preferred_element_type=jnp.float32) + bo.astype(jnp.float32)
    return out.astype(out_dtype)


def _reference_mha(query, key, value, params, mask, h):
    """Pure-JAX reference mirroring the PyTorch module (eval mode)."""
    wq, bq, wk, bk, wv, bv, wo, bo = params
    B, S, D = query.shape
    d_k = D // h

    def lin(x, w, b):
        return x @ w.T + b

    def split_heads(x):
        return x.reshape(B, S, h, d_k).transpose(0, 2, 1, 3)   # (B, h, S, d_k)

    q = split_heads(lin(query, wq, bq))
    k = split_heads(lin(key, wk, bk))
    v = split_heads(lin(value, wv, bv))

    scores = (q @ k.transpose(0, 1, 3, 2)) / math.sqrt(d_k)    # (B, h, S, S)
    if mask is not None:
        scores = jnp.where(mask[:, None, :, :] == 0, -1e9, scores)
    p = jax.nn.softmax(scores, axis=-1)
    x = p @ v                                                  # (B, h, S, d_k)
    x = x.transpose(0, 2, 1, 3).reshape(B, S, D)
    return lin(x, wo, bo)


if __name__ == "__main__":
    B, S, D, H = 2, 8, 32, 4   # batch, seq, d_model, heads -> d_k = 8

    key0 = jax.random.PRNGKey(0)
    keys = jax.random.split(key0, 11)

    query = jax.random.normal(keys[0], (B, S, D), jnp.float32)
    key_in = jax.random.normal(keys[1], (B, S, D), jnp.float32)
    value = jax.random.normal(keys[2], (B, S, D), jnp.float32)

    def init_linear(kw, kb):
        bound = 1.0 / math.sqrt(D)
        w = jax.random.uniform(kw, (D, D), jnp.float32, -bound, bound)
        b = jax.random.uniform(kb, (D,), jnp.float32, -bound, bound)
        return w, b

    wq, bq = init_linear(keys[3], keys[4])
    wk, bk = init_linear(keys[5], keys[6])
    wv, bv = init_linear(keys[7], keys[8])
    wo, bo = init_linear(keys[9], keys[10])
    params = (wq, bq, wk, bk, wv, bv, wo, bo)

    # Case 1: dense (B, S, S) mask (last two key positions of batch 1 masked out).
    mask_full = jnp.ones((B, S, S), jnp.float32).at[1, :, -2:].set(0.0)
    # Case 2: no mask (no dummy mask is materialized).
    # Case 3: (B, 1, S) key-padding mask (never densified to (B, S, S)).
    mask_pad = jnp.ones((B, 1, S), jnp.float32).at[1, :, -3:].set(0.0)

    for mk in (mask_full, None, mask_pad):
        out = multi_headed_attention(query, key_in, value, params, mask=mk, h=H)
        out = jax.block_until_ready(out)
        ref = _reference_mha(query, key_in, value, params, mk, H)
        assert out.shape == (B, S, D)
        # bf16 matmul operands (f32 accumulation) -> loosened tolerance vs. f32 reference.
        assert jnp.allclose(out, ref, atol=2e-2, rtol=2e-2), "mismatch vs. pure-JAX reference"

    print("KERNEL_OK")
</pallas_src>

<mosaic_0001>
module attributes {stable_mosaic.version = 11 : i64} {
  func.func @_flash_attn_kernel(%arg0: i32, %arg1: i32, %arg2: i32, %arg3: i32, %arg4: memref<1x1x8x8xbf16, #tpu.memory_space<vmem>>, %arg5: memref<1x1x8x8xbf16, #tpu.memory_space<vmem>>, %arg6: memref<1x1x8x8xbf16, #tpu.memory_space<vmem>>, %arg7: memref<1x8x8xi8, #tpu.memory_space<vmem>>, %arg8: memref<1x1x8x8xbf16, #tpu.memory_space<vmem>>, %arg9: memref<8x1xf32, #tpu.memory_space<vmem>>, %arg10: memref<8x1xf32, #tpu.memory_space<vmem>>, %arg11: memref<8x8xf32, #tpu.memory_space<vmem>>) attributes {dimension_semantics = [#tpu.dimension_semantics<parallel>, #tpu.dimension_semantics<parallel>, #tpu.dimension_semantics<parallel>, #tpu.dimension_semantics<arbitrary>], iteration_bounds = array<i64: 2, 4, 1, 1>, scalar_prefetch = 0 : i64, scratch_operands = 3 : i64, tpu.core_type = #tpu.core_type<tc>, window_params = [{transform_indices = @transform_0, window_bounds = array<i64: 1, 1, 8, 8>}, {transform_indices = @transform_1, window_bounds = array<i64: 1, 1, 8, 8>}, {transform_indices = @transform_2, window_bounds = array<i64: 1, 1, 8, 8>}, {transform_indices = @transform_3, window_bounds = array<i64: 1, 8, 8>}, {transform_indices = @transform_4, window_bounds = array<i64: 1, 1, 8, 8>}]} {
    %c0_i32 = arith.constant 0 : i32
    %0 = arith.cmpi eq, %arg3, %c0_i32 : i32
    %1 = arith.extui %0 : i1 to i32
    %c0_i32_0 = arith.constant 0 : i32
    %2 = arith.cmpi ne, %1, %c0_i32_0 : i32
    scf.if %2 {
      %cst_33 = arith.constant 0xFF800000 : f32
      %42 = vector.broadcast %cst_33 : f32 to vector<8x1xf32>
      %c0_34 = arith.constant 0 : index
      %c0_35 = arith.constant 0 : index
      %43 = vector.load %arg9[%c0_34, %c0_35] : memref<8x1xf32, #tpu.memory_space<vmem>>, vector<8x1xf32>
      tpu.vector_store %arg9[%c0_34, %c0_35], %42 {strides = array<i32>} : memref<8x1xf32, #tpu.memory_space<vmem>>, vector<8x1xf32>,
      %cst_36 = arith.constant 0.000000e+00 : f32
      %44 = vector.broadcast %cst_36 : f32 to vector<8x1xf32>
      %c0_37 = arith.constant 0 : index
      %c0_38 = arith.constant 0 : index
      %45 = vector.load %arg10[%c0_37, %c0_38] : memref<8x1xf32, #tpu.memory_space<vmem>>, vector<8x1xf32>
      tpu.vector_store %arg10[%c0_37, %c0_38], %44 {strides = array<i32>} : memref<8x1xf32, #tpu.memory_space<vmem>>, vector<8x1xf32>,
      %cst_39 = arith.constant 0.000000e+00 : f32
      %46 = vector.broadcast %cst_39 : f32 to vector<8x8xf32>
      %c0_40 = arith.constant 0 : index
      %c0_41 = arith.constant 0 : index
      %47 = vector.load %arg11[%c0_40, %c0_41] : memref<8x8xf32, #tpu.memory_space<vmem>>, vector<8x8xf32>
      tpu.vector_store %arg11[%c0_40, %c0_41], %46 {strides = array<i32>} : memref<8x8xf32, #tpu.memory_space<vmem>>, vector<8x8xf32>,
    } else {
    }
    %c0 = arith.constant 0 : index
    %c0_1 = arith.constant 0 : index
    %c0_2 = arith.constant 0 : index
    %c0_3 = arith.constant 0 : index
    %3 = vector.load %arg4[%c0, %c0_1, %c0_2, %c0_3] : memref<1x1x8x8xbf16, #tpu.memory_space<vmem>>, vector<1x1x8x8xbf16>
    %4 = vector.shape_cast %3 : vector<1x1x8x8xbf16> to vector<8x8xbf16>
    %c0_4 = arith.constant 0 : index
    %c0_5 = arith.constant 0 : index
    %c0_6 = arith.constant 0 : index
    %c0_7 = arith.constant 0 : index
    %5 = vector.load %arg5[%c0_4, %c0_5, %c0_6, %c0_7] : memref<1x1x8x8xbf16, #tpu.memory_space<vmem>>, vector<1x1x8x8xbf16>
    %6 = vector.shape_cast %5 : vector<1x1x8x8xbf16> to vector<8x8xbf16>
    %c0_8 = arith.constant 0 : index
    %c0_9 = arith.constant 0 : index
    %c0_10 = arith.constant 0 : index
    %c0_11 = arith.constant 0 : index
    %7 = vector.load %arg6[%c0_8, %c0_9, %c0_10, %c0_11] : memref<1x1x8x8xbf16, #tpu.memory_space<vmem>>, vector<1x1x8x8xbf16>
    %8 = vector.shape_cast %7 : vector<1x1x8x8xbf16> to vector<8x8xbf16>
    %cst = arith.constant dense<0.000000e+00> : vector<8x8xf32>
    %9 = tpu.matmul %4, %6, %cst {dimension_numbers = #tpu.dot_dimension_numbers<[1], [1], [0], [0], [0, 0, 1, 0], [], []>} : vector<8x8xbf16>, vector<8x8xbf16>, vector<8x8xf32> -> vector<8x8xf32>
    %c0_12 = arith.constant 0 : index
    %c0_13 = arith.constant 0 : index
    %c0_14 = arith.constant 0 : index
    %10 = vector.load %arg7[%c0_12, %c0_13, %c0_14] : memref<1x8x8xi8, #tpu.memory_space<vmem>>, vector<1x8x8xi8>
    %11 = vector.shape_cast %10 : vector<1x8x8xi8> to vector<8x8xi8>
    %c0_i8 = arith.constant 0 : i8
    %12 = vector.broadcast %c0_i8 : i8 to vector<8x8xi8>
    %13 = arith.cmpi ne, %11, %12 : vector<8x8xi8>
    %cst_15 = arith.constant -1.000000e+09 : f32
    %14 = vector.broadcast %cst_15 : f32 to vector<8x8xf32>
    %15 = arith.select %13, %9, %14 : vector<8x8xi1>, vector<8x8xf32>
    %c0_16 = arith.constant 0 : index
    %c0_17 = arith.constant 0 : index
    %16 = vector.load %arg9[%c0_16, %c0_17] : memref<8x1xf32, #tpu.memory_space<vmem>>, vector<8x1xf32>
    %cst_18 = arith.constant dense<0xFF800000> : vector<8xf32>
    %17 = vector.multi_reduction <maximumf>, %15, %cst_18 [1] : vector<8x8xf32> to vector<8xf32>
    %18 = vector.shape_cast %17 : vector<8xf32> to vector<8x1xf32>
    %19 = arith.maximumf %16, %18 : vector<8x1xf32>
    %20 = arith.subf %16, %19 : vector<8x1xf32>
    %21 = math.exp %20 : vector<8x1xf32>
    %22 = vector.broadcast %19 : vector<8x1xf32> to vector<8x8xf32>
    %23 = arith.subf %15, %22 : vector<8x8xf32>
    %24 = math.exp %23 : vector<8x8xf32>
    %c0_19 = arith.constant 0 : index
    %c0_20 = arith.constant 0 : index
    %25 = vector.load %arg10[%c0_19, %c0_20] : memref<8x1xf32, #tpu.memory_space<vmem>>, vector<8x1xf32>
    %26 = arith.mulf %21, %25 : vector<8x1xf32>
    %cst_21 = arith.constant dense<0.000000e+00> : vector<8xf32>
    %27 = vector.multi_reduction <add>, %24, %cst_21 [1] : vector<8x8xf32> to vector<8xf32>
    %28 = vector.shape_cast %27 : vector<8xf32> to vector<8x1xf32>
    %29 = arith.addf %26, %28 : vector<8x1xf32>
    %c0_22 = arith.constant 0 : index
    %c0_23 = arith.constant 0 : index
    %30 = vector.load %arg10[%c0_22, %c0_23] : memref<8x1xf32, #tpu.memory_space<vmem>>, vector<8x1xf32>
    tpu.vector_store %arg10[%c0_22, %c0_23], %29 {strides = array<i32>} : memref<8x1xf32, #tpu.memory_space<vmem>>, vector<8x1xf32>,
    %c0_24 = arith.constant 0 : index
    %c0_25 = arith.constant 0 : index
    %31 = vector.load %arg11[%c0_24, %c0_25] : memref<8x8xf32, #tpu.memory_space<vmem>>, vector<8x8xf32>
    %32 = vector.broadcast %21 : vector<8x1xf32> to vector<8x8xf32>
    %33 = arith.mulf %32, %31 : vector<8x8xf32>
    %34 = arith.truncf %24 : vector<8x8xf32> to vector<8x8xbf16>
    %cst_26 = arith.constant dense<0.000000e+00> : vector<8x8xf32>
    %35 = tpu.matmul %34, %8, %cst_26 {dimension_numbers = #tpu.dot_dimension_numbers<[1], [0], [0], [1], [0, 0, 1, 1], [], []>} : vector<8x8xbf16>, vector<8x8xbf16>, vector<8x8xf32> -> vector<8x8xf32>
    %36 = arith.addf %33, %35 : vector<8x8xf32>
    %c0_27 = arith.constant 0 : index
    %c0_28 = arith.constant 0 : index
    %37 = vector.load %arg11[%c0_27, %c0_28] : memref<8x8xf32, #tpu.memory_space<vmem>>, vector<8x8xf32>
    tpu.vector_store %arg11[%c0_27, %c0_28], %36 {strides = array<i32>} : memref<8x8xf32, #tpu.memory_space<vmem>>, vector<8x8xf32>,
    %c0_29 = arith.constant 0 : index
    %c0_30 = arith.constant 0 : index
    %38 = vector.load %arg9[%c0_29, %c0_30] : memref<8x1xf32, #tpu.memory_space<vmem>>, vector<8x1xf32>
    tpu.vector_store %arg9[%c0_29, %c0_30], %19 {strides = array<i32>} : memref<8x1xf32, #tpu.memory_space<vmem>>, vector<8x1xf32>,
    %c0_i32_31 = arith.constant 0 : i32
    %39 = arith.cmpi eq, %arg3, %c0_i32_31 : i32
    %40 = arith.extui %39 : i1 to i32
    %c0_i32_32 = arith.constant 0 : i32
    %41 = arith.cmpi ne, %40, %c0_i32_32 : i32
    scf.if %41 {
      %c0_33 = arith.constant 0 : index
      %c0_34 = arith.constant 0 : index
      %42 = vector.load %arg10[%c0_33, %c0_34] : memref<8x1xf32, #tpu.memory_space<vmem>>, vector<8x1xf32>
      %43 = tpu.reciprocal %42 {approx = true} : vector<8x1xf32> -> vector<8x1xf32>
      %c0_35 = arith.constant 0 : index
      %c0_36 = arith.constant 0 : index
      %44 = vector.load %arg11[%c0_35, %c0_36] : memref<8x8xf32, #tpu.memory_space<vmem>>, vector<8x8xf32>
      %45 = vector.broadcast %43 : vector<8x1xf32> to vector<8x8xf32>
      %46 = arith.mulf %44, %45 : vector<8x8xf32>
      %47 = arith.truncf %46 : vector<8x8xf32> to vector<8x8xbf16>
      %c0_37 = arith.constant 0 : index
      %c0_38 = arith.constant 0 : index
      %c0_39 = arith.constant 0 : index
      %c0_40 = arith.constant 0 : index
      %48 = vector.load %arg8[%c0_37, %c0_38, %c0_39, %c0_40] : memref<1x1x8x8xbf16, #tpu.memory_space<vmem>>, vector<1x1x8x8xbf16>
      %49 = vector.shape_cast %48 : vector<1x1x8x8xbf16> to vector<8x8xbf16>
      %50 = vector.shape_cast %47 : vector<8x8xbf16> to vector<1x1x8x8xbf16>
      tpu.vector_store %arg8[%c0_37, %c0_38, %c0_39, %c0_40], %50 {strides = array<i32>} : memref<1x1x8x8xbf16, #tpu.memory_space<vmem>>, vector<1x1x8x8xbf16>,
    } else {
    }
    return
  }
  func.func @transform_0(%arg0: i32, %arg1: i32, %arg2: i32, %arg3: i32) -> (i32, i32, i32, i32) {
    %c0_i32 = arith.constant 0 : i32
    %c0_i32_0 = arith.constant 0 : i32
    return %arg0, %arg1, %arg2, %c0_i32 : i32, i32, i32, i32
  }
  func.func @transform_1(%arg0: i32, %arg1: i32, %arg2: i32, %arg3: i32) -> (i32, i32, i32, i32) {
    %c0_i32 = arith.constant 0 : i32
    %c0_i32_0 = arith.constant 0 : i32
    return %arg0, %arg1, %arg3, %c0_i32 : i32, i32, i32, i32
  }
  func.func @transform_2(%arg0: i32, %arg1: i32, %arg2: i32, %arg3: i32) -> (i32, i32, i32, i32) {
    %c0_i32 = arith.constant 0 : i32
    %c0_i32_0 = arith.constant 0 : i32
    return %arg0, %arg1, %arg3, %c0_i32 : i32, i32, i32, i32
  }
  func.func @transform_3(%arg0: i32, %arg1: i32, %arg2: i32, %arg3: i32) -> (i32, i32, i32) {
    %c0_i32 = arith.constant 0 : i32
    return %arg0, %arg2, %arg3 : i32, i32, i32
  }
  func.func @transform_4(%arg0: i32, %arg1: i32, %arg2: i32, %arg3: i32) -> (i32, i32, i32, i32) {
    %c0_i32 = arith.constant 0 : i32
    %c0_i32_0 = arith.constant 0 : i32
    return %arg0, %arg1, %arg2, %c0_i32 : i32, i32, i32, i32
  }
}

</mosaic_0001>

<bundles_post_ra>
// kernel: tpu_custom_call.1
= control target key start
LH: loop header
LB: loop body
LE: loop exit
PB: predicated region body
PF: predicated region fallthrough
CT: control target
= control target key end

     0   :  { %s1313_s0 = inlined_call_operand.hbm [shape: bf16[2,4,8,8], index: 0, kind: input, shape index: {}]   ;;  %s1314_s1 = inlined_call_operand.hbm [shape: bf16[2,4,8,8], index: 1, kind: input, shape index: {}]   ;;  %s1315_s2 = inlined_call_operand.hbm [shape: bf16[2,4,8,8], index: 2, kind: input, shape index: {}]   ;;  %s1316_s3 = inlined_call_operand.vmem [shape: s8[2,8,8], index: 3, kind: input, shape index: {}]   ;;  %s1317_s4 = inlined_call_operand.hbm [shape: bf16[2,4,8,8], index: 4, kind: output, shape index: {}]  }
   0x1   :  { %1324 = sst [smem:[#allocation21_spill]] %s1314_s1 }
   0x2   :  { %9 = vsyncpa [#allocation6], 0 }
   0x3   :  { %11 = vsyncpa [#allocation6 + $0x1], 0 }
   0x4   :  { %12 = vsyncpa [#allocation9], 0 }
   0x5   :  { %14 = vsyncpa [#allocation9 + $0x1], 0 }
   0x6   :  { %15 = vsyncpa [#allocation7], 0 }
   0x7   :  { %17 = vsyncpa [#allocation7 + $0x1], 0  ;;  %s1077_s15 = smov 0   ;;  %s1079_s16 = smov 0  }
   0x8   :  { %s1081_s17 = smov 0   ;;  %s1083_s18 = smov 0  }
   0x9   :  { %s1085_s19 = smov 0   ;;  %s1087_s20 = smov 0  }
   0xa   :  { %s1089_s21 = smov 0   ;;  %s1091_s22 = smov 0  }
   0xb LB: > { %1325 = sst [smem:[#allocation15_spill]] %s1034_s20  ;;  %s1118_s23 = sadd.s32 4294967295, %s1042_s22   ;;  %s1042_s22 = sphi %s1091_s22, %s23_s22   ;;  %s1038_s21 = sphi %s1089_s21, %s1344_s21   ;;  %s1034_s20 = sphi %s1087_s20, %s1348_s20   ;;  %s1030_s19 = sphi %s1085_s19, %s1342_s19   ;;  %s1026_s18 = sphi %s1083_s18, %s1341_s18   ;;  %s1022_s17 = sphi %s1081_s17, %s1347_s17   ;;  %s1018_s16 = sphi %s1079_s16, %s1346_s16   ;;  %s1014_s15 = sphi %s1077_s15, %s1345_s15  }
   0xc   : > { %1326 = sst [smem:[#allocation16_spill]] %s1038_s21  ;;  %s717_s24 = sadd.s32 4294967294, %s1042_s22  }
   0xd   : > { %s45_s25 = sadd.s32 1, %s1034_s20  ;;  %s49_s26 = sadd.s32 1, %s1038_s21 }
   0xe   : > { %p47_p0 = scmp.ge.s32.totalorder %s45_s25, 4  ;;  %s60_s27 = sadd.s32 1, %s1022_s17 }
   0xf   : > { %p67_p1 = scmp.ne.s32.totalorder %s1022_s17, %s1018_s16  ;;  %p68_p2 = scmp.eq.s32.totalorder %s1042_s22, 0 }
  0x10   : > { %s1350_s25 = smov (%p47_p0, %s45_s25), 0  ;;  %s1352_s26 = smov (!%p47_p0, %s49_s26), %s1038_s21 }
  0x11   : > { %1327 = sst [smem:[#allocation17_spill]] %s1350_s25  ;;  %s54_s28 = ssub.s32 %s1034_s20, %s1350_s25 }
  0x12   : > { %p1132_p3 = por %p68_p2, %p67_p1  ;;  %p51_p4 = scmp.ge.s32.totalorder %s1352_s26, 2 }
  0x13   : > { %p73_p5 = scmp.ne.s32.totalorder %s1018_s16, %s1014_s15  ;;  %p74_p6 = scmp.eq.s32.totalorder %s1118_s23, 0 }
  0x14   : > { %p191_p7 = scmp.eq.s32.totalorder %s1118_s23, 7  ;;  %s1354_s26 = smov (%p51_p4, %s1352_s26), 0 }
  0x15   : > { %1329 = sst [smem:[#allocation18_spill]] %s1354_s26  ;;  %p1142_p8 = por %p74_p6, %p73_p5 }
  0x16   : > { %p1146_p9 = por %p191_p7, %p67_p1  ;;  %s53_s6 = ssub.s32 %s1038_s21, %s1354_s26 }
  0x17   : > { %p197_p10 = scmp.eq.s32.totalorder %s717_s24, 7  ;;  %s55_s7 = sor.u32 %s54_s28, %s53_s6 }
  0x18   : > { %p58_p11 = scmp.eq.s32.totalorder %s55_s7, 0  ;;  %p780_p13 = scmp.lt.s32.totalorder %s1042_s22, 8 }
  0x19   : > { %p1152_p12 = por %p197_p10, %p73_p5  ;;  %s1318_s9 = sand.u32 1, %s1022_s17  }
  0x1a   : > { %s1159_s10 = scalar_select %p58_p11, %s1022_s17, %s60_s27  }
  0x1b   : > { %s1332_s8 = scalar_select %p1152_p12, 1, 0 }
  0x1c   : > { %1334 = sst [smem:[#allocation20_spill]] %s1159_s10  ;;  %s1163_s11 = sshll.u32 %s1318_s9, 2 }
  0x1d   : > { %1333 = sst [smem:[#allocation19_spill]] %s1332_s8  ;;  %s721_s12 = sshll.u32 %s1038_s21, 2 }
  0x1e   : > { %s227_s13 = sadd.s32 %s1034_s20, %s721_s12  ;;  %p1169_p0 = pnand %p780_p13, %p1132_p3 }
  0x1f   : > { %s1173_s24 = sshll.u32 %s227_s13, 6  ;;  %s238_s28 = sand.u32 1, %s1042_s22  }
  0x20   : > { %s1336_s1 = sld [smem:[#allocation21_spill]]  ;;  %s242_s9 = scalar_lea.vmem [#allocation8], %s1163_s11 }
  0x21   : > { %s252_s26 = sshll.u32 %s242_s9, 4  ;;  %p729_p1 = scmp.ge.s32.totalorder %s1042_s22, 1  ;;  %s253_s26 = int_to_ptr.vmem [resolvable:$true] %s252_s26 }
  0x22   : > { %p291_p2 = scmp.lt.s32.totalorder %s1042_s22, 9  ;;  %s1183_s29 = scalar_lea.sflag [#allocation9], %s238_s28 }
  0x23   : > { %p860_p3 = pneg %p1169_p0  ;;  %s871_s12 = scalar_lea.vmem %s253_s26, 64 }
  0x24   : > { %p872_p4 = scmp.ne.s32.totalorder %s253_s26, %s871_s12  ;;  %s1044_s13 = smov [#allocation8]  }
  0x25   : > { %s876_s25 = sshll.u32 %s1044_s13, 4  ;;  %s877_s25 = int_to_ptr.vmem [resolvable:$false] %s876_s25 }
  0x26   : > { %s250_s7 = scalar_lea.hbm %s1336_s1, %s1173_s24  ;;  %p874_p5 = pnand %p872_p4, %p860_p3 }
  0x27   : > { %s878_s6 = scalar_lea.vmem %s877_s25, 128  ;;  %p879_p7 = scmp.lt.s32.totalorder %s253_s26, %s877_s25 }
  0x28   : > { %p875_p6 = pneg %p874_p5  ;;  %p880_p10 = scmp.lt.s32.totalorder %s878_s6, %s871_s12 }
  0x2a   : > { %p881_p11 = por %p880_p10, %p879_p7 }
  0x2c   : > { %p882_p13 = pnand %p881_p11, %p875_p6 }
  0x2e   : > { %885 = shalt.err (!%p882_p13)
}
  0x2f   : > { %772 = dma.hbm_to_vmem [thread:$0]  (!%p1169_p0), %s250_s7, 64, %s253_s26, %s1183_s29  }
  0x30   : > { %p1197_p4 = pnand %p729_p1, %p291_p2  ;;  %s229_s27 = scalar_lea.hbm %s1313_s0, %s1173_s24 }
  0x31   : > { %s221_s12 = scalar_lea.vmem [#allocation5], %s1163_s11  ;;  %s271_s21 = scalar_lea.hbm %s1315_s2, %s1173_s24 }
  0x32   : > { %s231_s13 = sshll.u32 %s221_s12, 4  ;;  %s1338_s20 = sand.u32 1, %s1022_s17   ;;  %s232_s13 = int_to_ptr.vmem [resolvable:$true] %s231_s13 }
  0x33   : > { %s218_s10 = scalar_lea.sflag [#allocation6], %s1338_s20  ;;  %s899_s26 = scalar_lea.vmem %s232_s13, 64 }
  0x34   : > { %p900_p5 = scmp.ne.s32.totalorder %s232_s13, %s899_s26  ;;  %s1045_s7 = smov [#allocation5]  }
  0x35   : > { %s904_s8 = sshll.u32 %s1045_s7, 4  ;;  %s905_s8 = int_to_ptr.vmem [resolvable:$false] %s904_s8 }
  0x36   : > { %p902_p1 = pnand %p900_p5, %p860_p3  ;;  %s906_s25 = scalar_lea.vmem %s905_s8, 128 }
  0x37   : > { %p907_p6 = scmp.lt.s32.totalorder %s232_s13, %s905_s8  ;;  %p908_p7 = scmp.lt.s32.totalorder %s906_s25, %s899_s26 }
  0x38   : > { %p903_p2 = pneg %p902_p1 }
  0x39   : > { %p909_p10 = por %p908_p7, %p907_p6 }
  0x3b   : > { %p910_p11 = pnand %p909_p10, %p903_p2 }
  0x3d   : > { %913 = shalt.err (!%p910_p11)
}
  0x3e   : > { %769 = dma.hbm_to_vmem [thread:$0]  (!%p1169_p0), %s229_s27, 64, %s232_s13, %s218_s10  }
  0x3f   : > { %s263_s1 = scalar_lea.vmem [#allocation10], %s1163_s11  ;;  %s1046_s12 = smov [#allocation10]  }
  0x40   : > { %s273_s20 = sshll.u32 %s263_s1, 4  ;;  %s932_s8 = sshll.u32 %s1046_s12, 4  ;;  %s274_s20 = int_to_ptr.vmem [resolvable:$true] %s273_s20  ;;  %s933_s8 = int_to_ptr.vmem [resolvable:$false] %s932_s8 }
  0x41   : > { %s927_s28 = scalar_lea.vmem %s274_s20, 64  ;;  %s934_s6 = scalar_lea.vmem %s933_s8, 128 }
  0x42   : > { %p928_p13 = scmp.ne.s32.totalorder %s274_s20, %s927_s28  ;;  %p935_p2 = scmp.lt.s32.totalorder %s274_s20, %s933_s8 }
  0x43   : > { %p936_p6 = scmp.lt.s32.totalorder %s934_s6, %s927_s28 }
  0x44   : > { %p930_p5 = pnand %p928_p13, %p860_p3 }
  0x45   : > { %p937_p7 = por %p936_p6, %p935_p2 }
  0x46   : > { %p931_p1 = pneg %p930_p5 }
  0x48   : > { %p938_p10 = pnand %p937_p7, %p931_p1 }
  0x4a   : > { %941 = shalt.err (!%p938_p10)
}
  0x4b   : > { %775 = dma.hbm_to_vmem [thread:$0]  (!%p1169_p0), %s271_s21, 64, %s274_s20, %s1183_s29  }
  0x4c   : > { %295 = sbr.rel (%p1197_p4) target bundleno = 876 (0x36c), region = 36  ;;  %s1232_s27 = sand.u32 (!%p1197_p4), 1, %s1018_s16  }
  0x4d   : > { %s1235_s13 = sshll.u32 (!%p1197_p4), %s1232_s27, 2  ;;  %s298_s14 = scalar_lea.sflag (!%p1197_p4), [#allocation6], %s1232_s27 }
  0x4e   : > { %s301_s26 = scalar_lea.vmem (!%p1197_p4), [#allocation5], %s1235_s13 }
  0x51   : > { %1001 = dma.done.wait (%p1142_p8), %s298_s14, 64  }
  0x52   : > { %1003 = vsyncadd (%p1142_p8), %s298_s14, 4294967232  ;;  %s306_s21 = sand.u32 1, %s1118_s23   ;;  %s310_s29 = scalar_lea.vmem [#allocation8], %s1235_s13 }
  0x53   : > { %s307_s24 = scalar_lea.sflag [#allocation9], %s306_s21 }
  0x54   : > { %1005 = dma.done.wait (%p1142_p8), %s307_s24, 128  }
  0x55   : > { %1007 = vsyncadd (%p1142_p8), %s307_s24, 4294967168  ;;  %vm384_vm0 = vcmask 64512   ;;  %v1047_v0 = vmov 0.0   ;;  %vm1048_vm1 = vmmov 0   ;;  %v387_v1 = vld [vmem:[%s310_s29] sm:$0xf] }
  0x56   : > { %746 = vmatprep.subr.bf16.mxu0 %v1047_v0  ;;  %385 = vst.msk [vmem:[#allocation4] sm:$0xff] %vm384_vm0, %v1047_v0  ;;  %748 = vmatprep.mubr.msk.bf16.mxu0 %vm1048_vm1, %v1047_v0  ;;  %v394_v2 = vsel %vm384_vm0, %v387_v1, 0  ;;  %v386_v3 = vld [vmem:[%s301_s26] sm:$0xf]  ;;  %v1049_v4 = vmov 0   ;;  %vm381_vm2 = vcmask 7168  }
  0x57   : > { %752 = vmatprep.subr.bf16.mxu1 %v1047_v0  ;;  %754 = vmatprep.mubr.msk.bf16.mxu1 %vm1048_vm1, %v1047_v0  ;;  %v1050_v5 = vmov -inf   ;;  %383 = vst.msk [vmem:[#allocation3] sm:$0xff] %vm381_vm2, %v1047_v0  ;;  %p364_p8 = scmp.lt.s32.totalorder %s1030_s19, 1  ;;  %vm477_vm5 = vcmask 1043456   ;;  %s319_s1 = scalar_lea.vmem [#allocation10], %s1235_s13  ;;  %vm537_vm6 = vcmask 60416  }
  0x58   : > { %747 = vmatpush3.bf16.xpose.msra.mxu0 %v394_v2  ;;  %850 = vset.pattern.permute.xlu0 %v1049_v4  ;;  %382 = vst.msk [vmem:[#allocation2] sm:$0xff] %vm381_vm2, %v1050_v5  ;;  %v388_v19 = vld [vmem:[%s319_s1] sm:$0xf]  ;;  %s738_s20 = sshll.u32 %s1030_s19, 2  ;;  %s363_s8 = scalar_lea.vmem [#allocation11], %s1235_s13 }
  0x59   : > { %851 = vset.pattern.permute.xlu1 %v1049_v4  ;;  %s365_s23 = scalar_select %p364_p8, %s1030_s19, 1  ;;  %v479_v20 = vsel %vm477_vm5, %v388_v19, 0 }
  0x5a   : > { %753 = vmatpush3.bf16.msra.mxu1 %v479_v20  ;;  %s552_s28 = sadd.s32 %s1026_s18, %s738_s20  ;;  %s556_s6 = sshll.u32 %s363_s8, 4  ;;  %s557_s6 = int_to_ptr.vmem [resolvable:$true] %s556_s6 }
  0x5b   : > { %s734_s30 = sshll.u32 %s365_s23, 1  ;;  %s739_s12 = sshll.u32 %s552_s28, 6 }
  0x5c   : > { %s373_s25 = scalar_lea.vmem %s1316_s3, %s734_s30  ;;  %s554_s14 = scalar_lea.hbm %s1317_s4, %s739_s12 }
  0x5d   : > { %v436_v6 = vld [vmem:[%s373_s25] sm:$0x3]  ;;  %v466_v35 = vld [vmem:[#allocation4] sm:$0xff]  ;;  %s540_s26 = scalar_lea.sflag [#allocation7], %s1232_s27  ;;  %s942_s21 = scalar_lea.vmem %s557_s6, 64 }
  0x5e   : > { %vm437_vm3 = vnez %v436_v6  ;;  %v458_v29 = vld [vmem:[#allocation3] sm:$0xff]  ;;  %p943_p0 = scmp.ne.s32.totalorder %s557_s6, %s942_s21  ;;  %s1051_s18 = smov [#allocation11]  }
  0x5f   : > { %749 = vmatmul.mubr.msk.bf16.vlgmr.msra.gmra.mxu0 %vm384_vm0, %v386_v3  ;;  %v438_v7 = vsel %vm437_vm3, 16843009, %v1049_v4  ;;  %v442_v15 = vld [vmem:[#allocation2] sm:$0xff]  ;;  %s946_s19 = sshll.u32 %s1051_s18, 4  ;;  %s947_s19 = int_to_ptr.vmem [resolvable:$false] %s946_s19 }
  0x60   : > { %v439_v8 = vunpack.c.0.s8 %v438_v7  ;;  %p944_p3 = pnand %p943_p0, %p1146_p9  ;;  %s948_s13 = scalar_lea.vmem %s947_s19, 128 }
  0x61   : > { %p949_p11 = scmp.lt.s32.totalorder %s557_s6, %s947_s19  ;;  %p950_p13 = scmp.lt.s32.totalorder %s948_s13, %s942_s21 }
  0x62   : > { %vm440_vm4 = vcmp.ne.s32.totalorder %v439_v8, 0  ;;  %p945_p4 = pneg %p944_p3 }
  0x63   : > { %p951_p5 = por %p950_p13, %p949_p11 }
  0x65   : > { %p952_p1 = pnand %p951_p5, %p945_p4 }
 0x11f   : > { %v430_v9 = vpop.f32.mrf.mxu0 }
 0x120   : > { %v441_v10 = vsel %vm440_vm4, %v430_v9, -1e+09 }
 0x121   : > { %v750_v11 = vpop.f32.mrf.mxu0  ;;  %v443_v12 = vsel %vm384_vm0, %v441_v10, -inf }
 0x122   : > { %444 = vmax.xlane.f32.xlu0 %v443_v12 }
 0x123   : > { %v433_v13 = vpop.f32.mrf.mxu0 }
 0x125   : > { %v751_v14 = vpop.f32.mrf.mxu0 }
 0x1ab   : > { %v445_v16 = vpop.xlane.xlu0 %444 }
 0x1ac   : > { %v446_v17 = vmax.f32 %v442_v15, %v445_v16 }
 0x1ae   : > { %v447_v18 = vsub.f32 %v442_v15, %v446_v17  ;;  %523 = vst.msk [vmem:[#allocation2] sm:$0xff] %vm381_vm2, %v446_v17  ;;  %452 = vperm.xlu0 %850, %v446_v17  }
 0x1b0   : > { %v448_v25 = vmul.f32 1.442695, %v447_v18 }
 0x229   : > { %v453_v21 = vpop.permute.xlu0 %452 }
 0x22a   : > { %v455_v22 = vsub.f32 %v441_v10, %v453_v21 }
 0x22c   : > { %v456_v23 = vmul.f32 1.442695, %v455_v22 }
 0x22e   : > { %852 = vpow2.f32 %v456_v23 }
 0x22f   : > { %854 = vpow2.f32 %v448_v25 }
 0x23b   : > { %v853_v24 = vpop.eup %852 }
 0x23c   : > { %v460_v26 = vsel %vm384_vm0, %v853_v24, 0.0  ;;  %v473_v27 = vpack.c.bf16 %v853_v24, %v853_v24  ;;  %v855_v28 = vpop.eup %854 }
 0x23d   : > { %461 = vadd.xlane.f32.xlu1 %v460_v26  ;;  %v459_v30 = vmul.f32 %v855_v28, %v458_v29 }
 0x23e   : > { %755 = vmatmul.mubr.msk.bf16.vlgmr.msra.gmra.mxu1 %vm384_vm0, %v473_v27 }
 0x24e   : > { %469 = vperm.xlu1 %851, %v855_v28  }
 0x2c6   : > { %v462_v31 = vpop.xlane.xlu1 %461 }
 0x2c7   : > { %v463_v32 = vadd.f32 %v462_v31, %v459_v30 }
 0x2c9   : > { %465 = vst.msk [vmem:[#allocation3] sm:$0xff] %vm381_vm2, %v463_v32 }
 0x2ca   : > { %v470_v36 = vpop.permute.xlu1 %469 }
 0x2cb   : > { %v472_v37 = vmul.f32 %v470_v36, %v466_v35 }
 0x2d0   : > { %v527_v33 = vld [vmem:[#allocation3] sm:$0xff] }
 0x2d1   : > { %856 = vrcp.f32 %v527_v33 }
 0x2de   : > { %v857_v34 = vpop.eup %856 }
 0x2df   : > { %532 = vperm.xlu1 %851, %v857_v34  }
 0x2fe   : > { %v515_v38 = vpop.f32.mrf.mxu1 }
 0x2ff   : > { %v521_v39 = vadd.f32 %v515_v38, %v472_v37 }
 0x300   : > { %v756_v40 = vpop.f32.mrf.mxu1 }
 0x301   : > { %522 = vst.msk [vmem:[#allocation4] sm:$0xff] %vm384_vm0, %v521_v39 }
 0x302   : > { %v518_v41 = vpop.f32.mrf.mxu1 }
 0x304   : > { %v757_v42 = vpop.f32.mrf.mxu1 }
 0x308   : > { %v529_v43 = vld [vmem:[#allocation4] sm:$0xff] }
 0x35a   : > { %v533_v44 = vpop.permute.xlu1 %532 }
 0x35b   : > { %v535_v45 = vmul.f32 %v533_v44, %v529_v43 }
 0x35d   : > { %v536_v46 = vpack.c.bf16 %v535_v45, %v535_v45 }
 0x35f   : > { %538 = vst.msk [vmem:[%s363_s8] sm:$0xf] %vm537_vm6, %v536_v46 }
 0x360   : > { %955 = shalt.err (!%p952_p1)
}
 0x361   : > { %s956_s24 = scalar_lea.hbm %s554_s14, 64  ;;  %s960_s23 = scalar_lea.hbm %s1317_s4, 512 }
 0x362   : > { %p957_p2 = scmp.ne.s32.totalorder %s554_s14, %s956_s24  ;;  %p961_p10 = scmp.lt.s32.totalorder %s554_s14, %s1317_s4 }
 0x363   : > { %p962_p8 = scmp.lt.s32.totalorder %s960_s23, %s956_s24 }
 0x364   : > { %p958_p6 = pnand %p957_p2, %p1146_p9 }
 0x365   : > { %p963_p0 = por %p962_p8, %p961_p10 }
 0x366   : > { %p959_p7 = pneg %p958_p6 }
 0x368   : > { %p964_p3 = pnand %p963_p0, %p959_p7 }
 0x36a   : > { %967 = shalt.err (!%p964_p3)
}
 0x36b   : > { %764 = dma.vmem_to_hbm [thread:$0]  (%p1146_p9), %s557_s6, 64, %s554_s14, %s540_s26  }
 0x36c PF: > { %p781_p4 = scmp.ge.s32.totalorder %s1042_s22, 2  ;;  %s568_s25 = sand.u32 1, %s1014_s15  }
 0x36d   : > { %s569_s1 = scalar_lea.sflag [#allocation7], %s568_s25 }
 0x36e   : > { %p777_p11 = pnand %p781_p4, %p1152_p12 }
 0x370   : > { %p778_p13 = pneg %p777_p11 }
 0x372   : > { %1009 = dma.done.wait (%p778_p13), %s569_s1, 64  }
 0x373   : > { %1011 = vsyncadd (%p778_p13), %s569_s1, 4294967232  ;;  %s23_s22 = sadd.s32 1, %s1042_s22   ;;  %s1340_s20 = sld [smem:[#allocation20_spill]] }
 0x374   : > { %p20_p5 = scmp.ge.s32.totalorder %s23_s22, 10   ;;  %s1341_s18 = sld [smem:[#allocation15_spill]] }
 0x375   : > { %s1342_s19 = sld [smem:[#allocation16_spill]]  ;;  %s1345_s15 = smov %s1018_s16 }
 0x376   : > { %s1343_s5 = sld [smem:[#allocation17_spill]]  ;;  %s1346_s16 = smov %s1022_s17 }
 0x377   : > { %s1344_s21 = sld [smem:[#allocation18_spill]] }
 0x378   :  { %22 = sbr.rel (!%p20_p5) target bundleno = 11 (0xb), region = 116 }
 0x379   : > { %s1347_s17 = smov %s1340_s20 }
 0x37c   : > { %s1348_s20 = smov %s1343_s5 }
 0x37d   :  { %574 = vsyncpa [#allocation6], 1 }
 0x37e   :  { %576 = vsyncpa [#allocation6 + $0x1], 1 }
 0x37f   :  { %577 = vsyncpa [#allocation9], 1 }
 0x380   :  { %579 = vsyncpa [#allocation9 + $0x1], 1 }
 0x381   :  { %580 = vsyncpa [#allocation7], 1 }
 0x382   :  { %582 = vsyncpa [#allocation7 + $0x1], 1 }

</bundles_post_ra>
